<compile_context>
chip_gen: v6e
topology: v6e:2x2x1
jax: 0.10.0
libtpu: 0.0.40
codegen_flags: <defaults>
</compile_context>

<pallas_src>
import functools

import jax
import jax.numpy as jnp
from jax.experimental import pallas as pl
from jax.experimental.pallas import tpu as pltpu

_BIG = 1e30              # sentinel for padded feature columns: act(margin - _BIG) == 0
_MAX_STATIC_FEATURES = 256  # cap on per-grid-step feature chunk (static unroll depth)


def _activation(h, act):
    if act == "relu":
        return jnp.maximum(h, 0.0)
    elif act == "softplus":
        # numerically stable softplus: log1p(exp(-|h|)) + max(h, 0)
        return jnp.log1p(jnp.exp(-jnp.abs(h))) + jnp.maximum(h, 0.0)
    raise NotImplementedError(act)


def _hinge_sim_kernel(x_ref, ct_ref, o_ref, *, margin, act):
    # x_ref:  (TB, TF)  batch tile x feature chunk               (f32)
    # ct_ref: (TF, TC)  feature chunk x class tile (centroids^T) (f32)
    # o_ref:  (TB, TC)  f32 output tile; resident across the feature grid
    #         axis and used directly as the accumulator (no VMEM scratch).
    kf = pl.program_id(2)
    tf = x_ref.shape[1]

    # Statically unrolled loop over the feature chunk.  Each step adds the
    # rank-1 update act(margin - x[:, f] (outer) centT[f, :]) to the register
    # accumulator: pure VPU work, no (TB, TF, TC) intermediate, no lane-axis
    # reductions.  Per-feature temporaries are sliced straight from the refs
    # (static slices) so only the accumulator is long-lived in vregs.
    acc = jnp.zeros(o_ref.shape, jnp.float32)
    for f in range(tf):
        xf = x_ref[:, f:f + 1]       # (TB, 1) column of x
        cf = ct_ref[f:f + 1, :]      # (1, TC) row of centroids^T
        acc = acc + _activation(margin - xf * cf, act)

    @pl.when(kf == 0)
    def _():
        o_ref[...] = acc             # first chunk: plain store

    @pl.when(kf > 0)
    def _():
        o_ref[...] = o_ref[...] + acc   # later chunks: accumulate in place


def _round_up(n, m):
    return ((n + m - 1) // m) * m


def _pick_tile(total, pref, step):
    """Largest multiple of `step`, <= pref, that divides `total` (a multiple of step)."""
    t = max(step, min(pref - pref % step, total))
    while total % t:
        t -= step
    return t


def hinge_sim(x, centroids, *, margin=1.0, act="relu", tb=128, tc=128,
              centroids_transposed=False):
    """x: (B, nfeat), centroids: (nclass, nfeat) -> (B, nclass) float32.

    Pass centroids_transposed=True to provide centroids as (nfeat, nclass)
    and skip the wrapper-side transpose copy.
    """
    if act not in ("relu", "softplus"):
        raise NotImplementedError(act)

    B, F = x.shape
    if centroids_transposed:
        Fc, C = centroids.shape
        ct = centroids
    else:
        C, Fc = centroids.shape
        ct = centroids.T
    assert F == Fc, "feature dims of x and centroids must match"

    x = x if x.dtype == jnp.float32 else x.astype(jnp.float32)
    ct = ct if ct.dtype == jnp.float32 else ct.astype(jnp.float32)

    # ---- tiling -----------------------------------------------------------
    b_pad = _round_up(B, 8)
    c_pad = _round_up(C, 128)
    tb_eff = _pick_tile(b_pad, tb, 8)
    tc_eff = _pick_tile(c_pad, tc, 128)

    if F <= _MAX_STATIC_FEATURES:
        # Single full-width feature chunk -> no feature padding, no sentinel.
        f_pad, tf_eff = F, F
    else:
        f_pad = _round_up(F, 128)                    # minimal lane alignment
        tf_eff = 256 if f_pad % 256 == 0 else 128    # biggest chunk that divides

    # v7x has 2 TensorCores: guarantee >= 2 tiles on the parallel axes when
    # the problem allows it (no effect on v5e/v6e, 1 TC).
    if (b_pad // tb_eff) * (c_pad // tc_eff) < 2:
        if c_pad // tc_eff < 2 and c_pad >= 256:
            tc_eff = 128
        elif b_pad >= 16:
            half = b_pad // 2
            tb_eff = half if half % 8 == 0 else 8

    # ---- padding (only when actually needed) ------------------------------
    pb, pf, pc = b_pad - B, f_pad - F, c_pad - C
    if pb or pf:
        x = jnp.pad(x, ((0, pb), (0, pf)))
        if pf:
            # Sentinel columns: with (x=_BIG, centroid=1) each padded feature
            # contributes act(margin - _BIG) == 0 exactly for both relu and
            # the stable softplus.
            x = x.at[:, F:].set(_BIG)
    if pf or pc:
        ct = jnp.pad(ct, ((0, pf), (0, pc)))
        if pf:
            ct = ct.at[F:, :].set(1.0)

    grid = (b_pad // tb_eff, c_pad // tc_eff, f_pad // tf_eff)
    kernel = functools.partial(_hinge_sim_kernel, margin=float(margin), act=act)

    out = pl.pallas_call(
        kernel,
        out_shape=jax.ShapeDtypeStruct((b_pad, c_pad), jnp.float32),
        grid_spec=pltpu.PrefetchScalarGridSpec(
            num_scalar_prefetch=0,
            grid=grid,
            in_specs=[
                # x: batch tile x feature chunk
                pl.BlockSpec((tb_eff, tf_eff), lambda i, j, k: (i, k)),
                # centroids^T: feature chunk x class tile (lane-dense classes)
                pl.BlockSpec((tf_eff, tc_eff), lambda i, j, k: (k, j)),
            ],
            out_specs=pl.BlockSpec((tb_eff, tc_eff), lambda i, j, k: (i, j)),
        ),
        compiler_params=pltpu.CompilerParams(
            dimension_semantics=("parallel", "parallel", "arbitrary"),
        ),
    )(x, ct)

    if pb or pc:
        out = out[:B, :C]
    return out


def hinge_sim_ref(x, centroids, *, margin=1.0, act="relu"):
    h = margin - x[:, None, :].astype(jnp.float32) * centroids[None, :, :].astype(jnp.float32)
    if act == "relu":
        h = jnp.maximum(h, 0.0)
    else:
        h = jax.nn.softplus(h)
    return jnp.sum(h, axis=-1)


if __name__ == "__main__":
    key = jax.random.PRNGKey(0)
    kx, kc, kx2, kc2 = jax.random.split(key, 4)

    # Shapes implied by the module's forward: x (B, nfeat), centroids (nclass, nfeat).
    B, nfeat, nclass = 16, 32, 16
    x = jax.random.normal(kx, (B, nfeat), dtype=jnp.float32)
    centroids = jax.random.normal(kc, (nclass, nfeat), dtype=jnp.float32)  # codebook

    for act in ("relu", "softplus"):
        out = jax.block_until_ready(hinge_sim(x, centroids, margin=1.0, act=act))
        ref = hinge_sim_ref(x, centroids, margin=1.0, act=act)
        assert out.shape == (B, nclass)
        assert jnp.allclose(out, ref, atol=1e-4, rtol=1e-4), f"{act} mismatch vs reference"

    # Ragged / chunked-feature path: exercises batch & class padding, the
    # sentinel feature padding, and multi-chunk accumulation into o_ref.
    B2, nfeat2, nclass2 = 13, 300, 20
    x2 = jax.random.normal(kx2, (B2, nfeat2), dtype=jnp.float32)
    cent2 = jax.random.normal(kc2, (nclass2, nfeat2), dtype=jnp.float32)
    out2 = jax.block_until_ready(hinge_sim(x2, cent2, margin=0.5, act="relu"))
    ref2 = hinge_sim_ref(x2, cent2, margin=0.5, act="relu")
    assert out2.shape == (B2, nclass2)
    assert jnp.allclose(out2, ref2, atol=1e-3, rtol=1e-3), "chunked-path mismatch vs reference"

    print("KERNEL_OK")
</pallas_src>

<mosaic_0001>
module attributes {stable_mosaic.version = 11 : i64} {
  func.func @_hinge_sim_kernel(%arg0: i32, %arg1: i32, %arg2: i32, %arg3: memref<8x32xf32, #tpu.memory_space<vmem>>, %arg4: memref<32x128xf32, #tpu.memory_space<vmem>>, %arg5: memref<8x128xf32, #tpu.memory_space<vmem>>) attributes {dimension_semantics = [#tpu.dimension_semantics<parallel>, #tpu.dimension_semantics<parallel>, #tpu.dimension_semantics<arbitrary>], iteration_bounds = array<i64: 2, 1, 1>, scalar_prefetch = 0 : i64, scratch_operands = 0 : i64, tpu.core_type = #tpu.core_type<tc>, window_params = [{transform_indices = @transform_0, window_bounds = array<i64: 8, 32>}, {transform_indices = @transform_1, window_bounds = array<i64: 32, 128>}, {transform_indices = @transform_2, window_bounds = array<i64: 8, 128>}]} {
    %cst = arith.constant 0.000000e+00 : f32
    %0 = vector.broadcast %cst : f32 to vector<8x128xf32>
    %c0 = arith.constant 0 : index
    %c0_0 = arith.constant 0 : index
    %1 = vector.load %arg3[%c0, %c0_0] : memref<8x32xf32, #tpu.memory_space<vmem>>, vector<8x1xf32>
    %c0_1 = arith.constant 0 : index
    %c0_2 = arith.constant 0 : index
    %2 = vector.load %arg4[%c0_1, %c0_2] : memref<32x128xf32, #tpu.memory_space<vmem>>, vector<1x128xf32>
    %3 = vector.broadcast %1 : vector<8x1xf32> to vector<8x128xf32>
    %4 = vector.broadcast %2 : vector<1x128xf32> to vector<8x128xf32>
    %5 = arith.mulf %3, %4 : vector<8x128xf32>
    %cst_3 = arith.constant 1.000000e+00 : f32
    %6 = vector.broadcast %cst_3 : f32 to vector<8x128xf32>
    %7 = arith.subf %6, %5 : vector<8x128xf32>
    %cst_4 = arith.constant 0.000000e+00 : f32
    %8 = vector.broadcast %cst_4 : f32 to vector<8x128xf32>
    %9 = arith.maximumf %7, %8 : vector<8x128xf32>
    %10 = arith.addf %0, %9 : vector<8x128xf32>
    %c0_5 = arith.constant 0 : index
    %c1 = arith.constant 1 : index
    %11 = vector.load %arg3[%c0_5, %c1] : memref<8x32xf32, #tpu.memory_space<vmem>>, vector<8x1xf32>
    %c1_6 = arith.constant 1 : index
    %c0_7 = arith.constant 0 : index
    %12 = vector.load %arg4[%c1_6, %c0_7] : memref<32x128xf32, #tpu.memory_space<vmem>>, vector<1x128xf32>
    %13 = vector.broadcast %11 : vector<8x1xf32> to vector<8x128xf32>
    %14 = vector.broadcast %12 : vector<1x128xf32> to vector<8x128xf32>
    %15 = arith.mulf %13, %14 : vector<8x128xf32>
    %cst_8 = arith.constant 1.000000e+00 : f32
    %16 = vector.broadcast %cst_8 : f32 to vector<8x128xf32>
    %17 = arith.subf %16, %15 : vector<8x128xf32>
    %cst_9 = arith.constant 0.000000e+00 : f32
    %18 = vector.broadcast %cst_9 : f32 to vector<8x128xf32>
    %19 = arith.maximumf %17, %18 : vector<8x128xf32>
    %20 = arith.addf %10, %19 : vector<8x128xf32>
    %c0_10 = arith.constant 0 : index
    %c2 = arith.constant 2 : index
    %21 = vector.load %arg3[%c0_10, %c2] : memref<8x32xf32, #tpu.memory_space<vmem>>, vector<8x1xf32>
    %c2_11 = arith.constant 2 : index
    %c0_12 = arith.constant 0 : index
    %22 = vector.load %arg4[%c2_11, %c0_12] : memref<32x128xf32, #tpu.memory_space<vmem>>, vector<1x128xf32>
    %23 = vector.broadcast %21 : vector<8x1xf32> to vector<8x128xf32>
    %24 = vector.broadcast %22 : vector<1x128xf32> to vector<8x128xf32>
    %25 = arith.mulf %23, %24 : vector<8x128xf32>
    %cst_13 = arith.constant 1.000000e+00 : f32
    %26 = vector.broadcast %cst_13 : f32 to vector<8x128xf32>
    %27 = arith.subf %26, %25 : vector<8x128xf32>
    %cst_14 = arith.constant 0.000000e+00 : f32
    %28 = vector.broadcast %cst_14 : f32 to vector<8x128xf32>
    %29 = arith.maximumf %27, %28 : vector<8x128xf32>
    %30 = arith.addf %20, %29 : vector<8x128xf32>
    %c0_15 = arith.constant 0 : index
    %c3 = arith.constant 3 : index
    %31 = vector.load %arg3[%c0_15, %c3] : memref<8x32xf32, #tpu.memory_space<vmem>>, vector<8x1xf32>
    %c3_16 = arith.constant 3 : index
    %c0_17 = arith.constant 0 : index
    %32 = vector.load %arg4[%c3_16, %c0_17] : memref<32x128xf32, #tpu.memory_space<vmem>>, vector<1x128xf32>
    %33 = vector.broadcast %31 : vector<8x1xf32> to vector<8x128xf32>
    %34 = vector.broadcast %32 : vector<1x128xf32> to vector<8x128xf32>
    %35 = arith.mulf %33, %34 : vector<8x128xf32>
    %cst_18 = arith.constant 1.000000e+00 : f32
    %36 = vector.broadcast %cst_18 : f32 to vector<8x128xf32>
    %37 = arith.subf %36, %35 : vector<8x128xf32>
    %cst_19 = arith.constant 0.000000e+00 : f32
    %38 = vector.broadcast %cst_19 : f32 to vector<8x128xf32>
    %39 = arith.maximumf %37, %38 : vector<8x128xf32>
    %40 = arith.addf %30, %39 : vector<8x128xf32>
    %c0_20 = arith.constant 0 : index
    %c4 = arith.constant 4 : index
    %41 = vector.load %arg3[%c0_20, %c4] : memref<8x32xf32, #tpu.memory_space<vmem>>, vector<8x1xf32>
    %c4_21 = arith.constant 4 : index
    %c0_22 = arith.constant 0 : index
    %42 = vector.load %arg4[%c4_21, %c0_22] : memref<32x128xf32, #tpu.memory_space<vmem>>, vector<1x128xf32>
    %43 = vector.broadcast %41 : vector<8x1xf32> to vector<8x128xf32>
    %44 = vector.broadcast %42 : vector<1x128xf32> to vector<8x128xf32>
    %45 = arith.mulf %43, %44 : vector<8x128xf32>
    %cst_23 = arith.constant 1.000000e+00 : f32
    %46 = vector.broadcast %cst_23 : f32 to vector<8x128xf32>
    %47 = arith.subf %46, %45 : vector<8x128xf32>
    %cst_24 = arith.constant 0.000000e+00 : f32
    %48 = vector.broadcast %cst_24 : f32 to vector<8x128xf32>
    %49 = arith.maximumf %47, %48 : vector<8x128xf32>
    %50 = arith.addf %40, %49 : vector<8x128xf32>
    %c0_25 = arith.constant 0 : index
    %c5 = arith.constant 5 : index
    %51 = vector.load %arg3[%c0_25, %c5] : memref<8x32xf32, #tpu.memory_space<vmem>>, vector<8x1xf32>
    %c5_26 = arith.constant 5 : index
    %c0_27 = arith.constant 0 : index
    %52 = vector.load %arg4[%c5_26, %c0_27] : memref<32x128xf32, #tpu.memory_space<vmem>>, vector<1x128xf32>
    %53 = vector.broadcast %51 : vector<8x1xf32> to vector<8x128xf32>
    %54 = vector.broadcast %52 : vector<1x128xf32> to vector<8x128xf32>
    %55 = arith.mulf %53, %54 : vector<8x128xf32>
    %cst_28 = arith.constant 1.000000e+00 : f32
    %56 = vector.broadcast %cst_28 : f32 to vector<8x128xf32>
    %57 = arith.subf %56, %55 : vector<8x128xf32>
    %cst_29 = arith.constant 0.000000e+00 : f32
    %58 = vector.broadcast %cst_29 : f32 to vector<8x128xf32>
    %59 = arith.maximumf %57, %58 : vector<8x128xf32>
    %60 = arith.addf %50, %59 : vector<8x128xf32>
    %c0_30 = arith.constant 0 : index
    %c6 = arith.constant 6 : index
    %61 = vector.load %arg3[%c0_30, %c6] : memref<8x32xf32, #tpu.memory_space<vmem>>, vector<8x1xf32>
    %c6_31 = arith.constant 6 : index
    %c0_32 = arith.constant 0 : index
    %62 = vector.load %arg4[%c6_31, %c0_32] : memref<32x128xf32, #tpu.memory_space<vmem>>, vector<1x128xf32>
    %63 = vector.broadcast %61 : vector<8x1xf32> to vector<8x128xf32>
    %64 = vector.broadcast %62 : vector<1x128xf32> to vector<8x128xf32>
    %65 = arith.mulf %63, %64 : vector<8x128xf32>
    %cst_33 = arith.constant 1.000000e+00 : f32
    %66 = vector.broadcast %cst_33 : f32 to vector<8x128xf32>
    %67 = arith.subf %66, %65 : vector<8x128xf32>
    %cst_34 = arith.constant 0.000000e+00 : f32
    %68 = vector.broadcast %cst_34 : f32 to vector<8x128xf32>
    %69 = arith.maximumf %67, %68 : vector<8x128xf32>
    %70 = arith.addf %60, %69 : vector<8x128xf32>
    %c0_35 = arith.constant 0 : index
    %c7 = arith.constant 7 : index
    %71 = vector.load %arg3[%c0_35, %c7] : memref<8x32xf32, #tpu.memory_space<vmem>>, vector<8x1xf32>
    %c7_36 = arith.constant 7 : index
    %c0_37 = arith.constant 0 : index
    %72 = vector.load %arg4[%c7_36, %c0_37] : memref<32x128xf32, #tpu.memory_space<vmem>>, vector<1x128xf32>
    %73 = vector.broadcast %71 : vector<8x1xf32> to vector<8x128xf32>
    %74 = vector.broadcast %72 : vector<1x128xf32> to vector<8x128xf32>
    %75 = arith.mulf %73, %74 : vector<8x128xf32>
    %cst_38 = arith.constant 1.000000e+00 : f32
    %76 = vector.broadcast %cst_38 : f32 to vector<8x128xf32>
    %77 = arith.subf %76, %75 : vector<8x128xf32>
    %cst_39 = arith.constant 0.000000e+00 : f32
    %78 = vector.broadcast %cst_39 : f32 to vector<8x128xf32>
    %79 = arith.maximumf %77, %78 : vector<8x128xf32>
    %80 = arith.addf %70, %79 : vector<8x128xf32>
    %c0_40 = arith.constant 0 : index
    %c8 = arith.constant 8 : index
    %81 = vector.load %arg3[%c0_40, %c8] : memref<8x32xf32, #tpu.memory_space<vmem>>, vector<8x1xf32>
    %c8_41 = arith.constant 8 : index
    %c0_42 = arith.constant 0 : index
    %82 = vector.load %arg4[%c8_41, %c0_42] : memref<32x128xf32, #tpu.memory_space<vmem>>, vector<1x128xf32>
    %83 = vector.broadcast %81 : vector<8x1xf32> to vector<8x128xf32>
    %84 = vector.broadcast %82 : vector<1x128xf32> to vector<8x128xf32>
    %85 = arith.mulf %83, %84 : vector<8x128xf32>
    %cst_43 = arith.constant 1.000000e+00 : f32
    %86 = vector.broadcast %cst_43 : f32 to vector<8x128xf32>
    %87 = arith.subf %86, %85 : vector<8x128xf32>
    %cst_44 = arith.constant 0.000000e+00 : f32
    %88 = vector.broadcast %cst_44 : f32 to vector<8x128xf32>
    %89 = arith.maximumf %87, %88 : vector<8x128xf32>
    %90 = arith.addf %80, %89 : vector<8x128xf32>
    %c0_45 = arith.constant 0 : index
    %c9 = arith.constant 9 : index
    %91 = vector.load %arg3[%c0_45, %c9] : memref<8x32xf32, #tpu.memory_space<vmem>>, vector<8x1xf32>
    %c9_46 = arith.constant 9 : index
    %c0_47 = arith.constant 0 : index
    %92 = vector.load %arg4[%c9_46, %c0_47] : memref<32x128xf32, #tpu.memory_space<vmem>>, vector<1x128xf32>
    %93 = vector.broadcast %91 : vector<8x1xf32> to vector<8x128xf32>
    %94 = vector.broadcast %92 : vector<1x128xf32> to vector<8x128xf32>
    %95 = arith.mulf %93, %94 : vector<8x128xf32>
    %cst_48 = arith.constant 1.000000e+00 : f32
    %96 = vector.broadcast %cst_48 : f32 to vector<8x128xf32>
    %97 = arith.subf %96, %95 : vector<8x128xf32>
    %cst_49 = arith.constant 0.000000e+00 : f32
    %98 = vector.broadcast %cst_49 : f32 to vector<8x128xf32>
    %99 = arith.maximumf %97, %98 : vector<8x128xf32>
    %100 = arith.addf %90, %99 : vector<8x128xf32>
    %c0_50 = arith.constant 0 : index
    %c10 = arith.constant 10 : index
    %101 = vector.load %arg3[%c0_50, %c10] : memref<8x32xf32, #tpu.memory_space<vmem>>, vector<8x1xf32>
    %c10_51 = arith.constant 10 : index
    %c0_52 = arith.constant 0 : index
    %102 = vector.load %arg4[%c10_51, %c0_52] : memref<32x128xf32, #tpu.memory_space<vmem>>, vector<1x128xf32>
    %103 = vector.broadcast %101 : vector<8x1xf32> to vector<8x128xf32>
    %104 = vector.broadcast %102 : vector<1x128xf32> to vector<8x128xf32>
    %105 = arith.mulf %103, %104 : vector<8x128xf32>
    %cst_53 = arith.constant 1.000000e+00 : f32
    %106 = vector.broadcast %cst_53 : f32 to vector<8x128xf32>
    %107 = arith.subf %106, %105 : vector<8x128xf32>
    %cst_54 = arith.constant 0.000000e+00 : f32
    %108 = vector.broadcast %cst_54 : f32 to vector<8x128xf32>
    %109 = arith.maximumf %107, %108 : vector<8x128xf32>
    %110 = arith.addf %100, %109 : vector<8x128xf32>
    %c0_55 = arith.constant 0 : index
    %c11 = arith.constant 11 : index
    %111 = vector.load %arg3[%c0_55, %c11] : memref<8x32xf32, #tpu.memory_space<vmem>>, vector<8x1xf32>
    %c11_56 = arith.constant 11 : index
    %c0_57 = arith.constant 0 : index
    %112 = vector.load %arg4[%c11_56, %c0_57] : memref<32x128xf32, #tpu.memory_space<vmem>>, vector<1x128xf32>
    %113 = vector.broadcast %111 : vector<8x1xf32> to vector<8x128xf32>
    %114 = vector.broadcast %112 : vector<1x128xf32> to vector<8x128xf32>
    %115 = arith.mulf %113, %114 : vector<8x128xf32>
    %cst_58 = arith.constant 1.000000e+00 : f32
    %116 = vector.broadcast %cst_58 : f32 to vector<8x128xf32>
    %117 = arith.subf %116, %115 : vector<8x128xf32>
    %cst_59 = arith.constant 0.000000e+00 : f32
    %118 = vector.broadcast %cst_59 : f32 to vector<8x128xf32>
    %119 = arith.maximumf %117, %118 : vector<8x128xf32>
    %120 = arith.addf %110, %119 : vector<8x128xf32>
    %c0_60 = arith.constant 0 : index
    %c12 = arith.constant 12 : index
    %121 = vector.load %arg3[%c0_60, %c12] : memref<8x32xf32, #tpu.memory_space<vmem>>, vector<8x1xf32>
    %c12_61 = arith.constant 12 : index
    %c0_62 = arith.constant 0 : index
    %122 = vector.load %arg4[%c12_61, %c0_62] : memref<32x128xf32, #tpu.memory_space<vmem>>, vector<1x128xf32>
    %123 = vector.broadcast %121 : vector<8x1xf32> to vector<8x128xf32>
    %124 = vector.broadcast %122 : vector<1x128xf32> to vector<8x128xf32>
    %125 = arith.mulf %123, %124 : vector<8x128xf32>
    %cst_63 = arith.constant 1.000000e+00 : f32
    %126 = vector.broadcast %cst_63 : f32 to vector<8x128xf32>
    %127 = arith.subf %126, %125 : vector<8x128xf32>
    %cst_64 = arith.constant 0.000000e+00 : f32
    %128 = vector.broadcast %cst_64 : f32 to vector<8x128xf32>
    %129 = arith.maximumf %127, %128 : vector<8x128xf32>
    %130 = arith.addf %120, %129 : vector<8x128xf32>
    %c0_65 = arith.constant 0 : index
    %c13 = arith.constant 13 : index
    %131 = vector.load %arg3[%c0_65, %c13] : memref<8x32xf32, #tpu.memory_space<vmem>>, vector<8x1xf32>
    %c13_66 = arith.constant 13 : index
    %c0_67 = arith.constant 0 : index
    %132 = vector.load %arg4[%c13_66, %c0_67] : memref<32x128xf32, #tpu.memory_space<vmem>>, vector<1x128xf32>
    %133 = vector.broadcast %131 : vector<8x1xf32> to vector<8x128xf32>
    %134 = vector.broadcast %132 : vector<1x128xf32> to vector<8x128xf32>
    %135 = arith.mulf %133, %134 : vector<8x128xf32>
    %cst_68 = arith.constant 1.000000e+00 : f32
    %136 = vector.broadcast %cst_68 : f32 to vector<8x128xf32>
    %137 = arith.subf %136, %135 : vector<8x128xf32>
    %cst_69 = arith.constant 0.000000e+00 : f32
    %138 = vector.broadcast %cst_69 : f32 to vector<8x128xf32>
    %139 = arith.maximumf %137, %138 : vector<8x128xf32>
    %140 = arith.addf %130, %139 : vector<8x128xf32>
    %c0_70 = arith.constant 0 : index
    %c14 = arith.constant 14 : index
    %141 = vector.load %arg3[%c0_70, %c14] : memref<8x32xf32, #tpu.memory_space<vmem>>, vector<8x1xf32>
    %c14_71 = arith.constant 14 : index
    %c0_72 = arith.constant 0 : index
    %142 = vector.load %arg4[%c14_71, %c0_72] : memref<32x128xf32, #tpu.memory_space<vmem>>, vector<1x128xf32>
    %143 = vector.broadcast %141 : vector<8x1xf32> to vector<8x128xf32>
    %144 = vector.broadcast %142 : vector<1x128xf32> to vector<8x128xf32>
    %145 = arith.mulf %143, %144 : vector<8x128xf32>
    %cst_73 = arith.constant 1.000000e+00 : f32
    %146 = vector.broadcast %cst_73 : f32 to vector<8x128xf32>
    %147 = arith.subf %146, %145 : vector<8x128xf32>
    %cst_74 = arith.constant 0.000000e+00 : f32
    %148 = vector.broadcast %cst_74 : f32 to vector<8x128xf32>
    %149 = arith.maximumf %147, %148 : vector<8x128xf32>
    %150 = arith.addf %140, %149 : vector<8x128xf32>
    %c0_75 = arith.constant 0 : index
    %c15 = arith.constant 15 : index
    %151 = vector.load %arg3[%c0_75, %c15] : memref<8x32xf32, #tpu.memory_space<vmem>>, vector<8x1xf32>
    %c15_76 = arith.constant 15 : index
    %c0_77 = arith.constant 0 : index
    %152 = vector.load %arg4[%c15_76, %c0_77] : memref<32x128xf32, #tpu.memory_space<vmem>>, vector<1x128xf32>
    %153 = vector.broadcast %151 : vector<8x1xf32> to vector<8x128xf32>
    %154 = vector.broadcast %152 : vector<1x128xf32> to vector<8x128xf32>
    %155 = arith.mulf %153, %154 : vector<8x128xf32>
    %cst_78 = arith.constant 1.000000e+00 : f32
    %156 = vector.broadcast %cst_78 : f32 to vector<8x128xf32>
    %157 = arith.subf %156, %155 : vector<8x128xf32>
    %cst_79 = arith.constant 0.000000e+00 : f32
    %158 = vector.broadcast %cst_79 : f32 to vector<8x128xf32>
    %159 = arith.maximumf %157, %158 : vector<8x128xf32>
    %160 = arith.addf %150, %159 : vector<8x128xf32>
    %c0_80 = arith.constant 0 : index
    %c16 = arith.constant 16 : index
    %161 = vector.load %arg3[%c0_80, %c16] : memref<8x32xf32, #tpu.memory_space<vmem>>, vector<8x1xf32>
    %c16_81 = arith.constant 16 : index
    %c0_82 = arith.constant 0 : index
    %162 = vector.load %arg4[%c16_81, %c0_82] : memref<32x128xf32, #tpu.memory_space<vmem>>, vector<1x128xf32>
    %163 = vector.broadcast %161 : vector<8x1xf32> to vector<8x128xf32>
    %164 = vector.broadcast %162 : vector<1x128xf32> to vector<8x128xf32>
    %165 = arith.mulf %163, %164 : vector<8x128xf32>
    %cst_83 = arith.constant 1.000000e+00 : f32
    %166 = vector.broadcast %cst_83 : f32 to vector<8x128xf32>
    %167 = arith.subf %166, %165 : vector<8x128xf32>
    %cst_84 = arith.constant 0.000000e+00 : f32
    %168 = vector.broadcast %cst_84 : f32 to vector<8x128xf32>
    %169 = arith.maximumf %167, %168 : vector<8x128xf32>
    %170 = arith.addf %160, %169 : vector<8x128xf32>
    %c0_85 = arith.constant 0 : index
    %c17 = arith.constant 17 : index
    %171 = vector.load %arg3[%c0_85, %c17] : memref<8x32xf32, #tpu.memory_space<vmem>>, vector<8x1xf32>
    %c17_86 = arith.constant 17 : index
    %c0_87 = arith.constant 0 : index
    %172 = vector.load %arg4[%c17_86, %c0_87] : memref<32x128xf32, #tpu.memory_space<vmem>>, vector<1x128xf32>
    %173 = vector.broadcast %171 : vector<8x1xf32> to vector<8x128xf32>
    %174 = vector.broadcast %172 : vector<1x128xf32> to vector<8x128xf32>
    %175 = arith.mulf %173, %174 : vector<8x128xf32>
    %cst_88 = arith.constant 1.000000e+00 : f32
    %176 = vector.broadcast %cst_88 : f32 to vector<8x128xf32>
    %177 = arith.subf %176, %175 : vector<8x128xf32>
    %cst_89 = arith.constant 0.000000e+00 : f32
    %178 = vector.broadcast %cst_89 : f32 to vector<8x128xf32>
    %179 = arith.maximumf %177, %178 : vector<8x128xf32>
    %180 = arith.addf %170, %179 : vector<8x128xf32>
    %c0_90 = arith.constant 0 : index
    %c18 = arith.constant 18 : index
    %181 = vector.load %arg3[%c0_90, %c18] : memref<8x32xf32, #tpu.memory_space<vmem>>, vector<8x1xf32>
    %c18_91 = arith.constant 18 : index
    %c0_92 = arith.constant 0 : index
    %182 = vector.load %arg4[%c18_91, %c0_92] : memref<32x128xf32, #tpu.memory_space<vmem>>, vector<1x128xf32>
    %183 = vector.broadcast %181 : vector<8x1xf32> to vector<8x128xf32>
    %184 = vector.broadcast %182 : vector<1x128xf32> to vector<8x128xf32>
    %185 = arith.mulf %183, %184 : vector<8x128xf32>
    %cst_93 = arith.constant 1.000000e+00 : f32
    %186 = vector.broadcast %cst_93 : f32 to vector<8x128xf32>
    %187 = arith.subf %186, %185 : vector<8x128xf32>
    %cst_94 = arith.constant 0.000000e+00 : f32
    %188 = vector.broadcast %cst_94 : f32 to vector<8x128xf32>
    %189 = arith.maximumf %187, %188 : vector<8x128xf32>
    %190 = arith.addf %180, %189 : vector<8x128xf32>
    %c0_95 = arith.constant 0 : index
    %c19 = arith.constant 19 : index
    %191 = vector.load %arg3[%c0_95, %c19] : memref<8x32xf32, #tpu.memory_space<vmem>>, vector<8x1xf32>
    %c19_96 = arith.constant 19 : index
    %c0_97 = arith.constant 0 : index
    %192 = vector.load %arg4[%c19_96, %c0_97] : memref<32x128xf32, #tpu.memory_space<vmem>>, vector<1x128xf32>
    %193 = vector.broadcast %191 : vector<8x1xf32> to vector<8x128xf32>
    %194 = vector.broadcast %192 : vector<1x128xf32> to vector<8x128xf32>
    %195 = arith.mulf %193, %194 : vector<8x128xf32>
    %cst_98 = arith.constant 1.000000e+00 : f32
    %196 = vector.broadcast %cst_98 : f32 to vector<8x128xf32>
    %197 = arith.subf %196, %195 : vector<8x128xf32>
    %cst_99 = arith.constant 0.000000e+00 : f32
    %198 = vector.broadcast %cst_99 : f32 to vector<8x128xf32>
    %199 = arith.maximumf %197, %198 : vector<8x128xf32>
    %200 = arith.addf %190, %199 : vector<8x128xf32>
    %c0_100 = arith.constant 0 : index
    %c20 = arith.constant 20 : index
    %201 = vector.load %arg3[%c0_100, %c20] : memref<8x32xf32, #tpu.memory_space<vmem>>, vector<8x1xf32>
    %c20_101 = arith.constant 20 : index
    %c0_102 = arith.constant 0 : index
    %202 = vector.load %arg4[%c20_101, %c0_102] : memref<32x128xf32, #tpu.memory_space<vmem>>, vector<1x128xf32>
    %203 = vector.broadcast %201 : vector<8x1xf32> to vector<8x128xf32>
    %204 = vector.broadcast %202 : vector<1x128xf32> to vector<8x128xf32>
    %205 = arith.mulf %203, %204 : vector<8x128xf32>
    %cst_103 = arith.constant 1.000000e+00 : f32
    %206 = vector.broadcast %cst_103 : f32 to vector<8x128xf32>
    %207 = arith.subf %206, %205 : vector<8x128xf32>
    %cst_104 = arith.constant 0.000000e+00 : f32
    %208 = vector.broadcast %cst_104 : f32 to vector<8x128xf32>
    %209 = arith.maximumf %207, %208 : vector<8x128xf32>
    %210 = arith.addf %200, %209 : vector<8x128xf32>
    %c0_105 = arith.constant 0 : index
    %c21 = arith.constant 21 : index
    %211 = vector.load %arg3[%c0_105, %c21] : memref<8x32xf32, #tpu.memory_space<vmem>>, vector<8x1xf32>
    %c21_106 = arith.constant 21 : index
    %c0_107 = arith.constant 0 : index
    %212 = vector.load %arg4[%c21_106, %c0_107] : memref<32x128xf32, #tpu.memory_space<vmem>>, vector<1x128xf32>
    %213 = vector.broadcast %211 : vector<8x1xf32> to vector<8x128xf32>
    %214 = vector.broadcast %212 : vector<1x128xf32> to vector<8x128xf32>
    %215 = arith.mulf %213, %214 : vector<8x128xf32>
    %cst_108 = arith.constant 1.000000e+00 : f32
    %216 = vector.broadcast %cst_108 : f32 to vector<8x128xf32>
    %217 = arith.subf %216, %215 : vector<8x128xf32>
    %cst_109 = arith.constant 0.000000e+00 : f32
    %218 = vector.broadcast %cst_109 : f32 to vector<8x128xf32>
    %219 = arith.maximumf %217, %218 : vector<8x128xf32>
    %220 = arith.addf %210, %219 : vector<8x128xf32>
    %c0_110 = arith.constant 0 : index
    %c22 = arith.constant 22 : index
    %221 = vector.load %arg3[%c0_110, %c22] : memref<8x32xf32, #tpu.memory_space<vmem>>, vector<8x1xf32>
    %c22_111 = arith.constant 22 : index
    %c0_112 = arith.constant 0 : index
    %222 = vector.load %arg4[%c22_111, %c0_112] : memref<32x128xf32, #tpu.memory_space<vmem>>, vector<1x128xf32>
    %223 = vector.broadcast %221 : vector<8x1xf32> to vector<8x128xf32>
    %224 = vector.broadcast %222 : vector<1x128xf32> to vector<8x128xf32>
    %225 = arith.mulf %223, %224 : vector<8x128xf32>
    %cst_113 = arith.constant 1.000000e+00 : f32
    %226 = vector.broadcast %cst_113 : f32 to vector<8x128xf32>
    %227 = arith.subf %226, %225 : vector<8x128xf32>
    %cst_114 = arith.constant 0.000000e+00 : f32
    %228 = vector.broadcast %cst_114 : f32 to vector<8x128xf32>
    %229 = arith.maximumf %227, %228 : vector<8x128xf32>
    %230 = arith.addf %220, %229 : vector<8x128xf32>
    %c0_115 = arith.constant 0 : index
    %c23 = arith.constant 23 : index
    %231 = vector.load %arg3[%c0_115, %c23] : memref<8x32xf32, #tpu.memory_space<vmem>>, vector<8x1xf32>
    %c23_116 = arith.constant 23 : index
    %c0_117 = arith.constant 0 : index
    %232 = vector.load %arg4[%c23_116, %c0_117] : memref<32x128xf32, #tpu.memory_space<vmem>>, vector<1x128xf32>
    %233 = vector.broadcast %231 : vector<8x1xf32> to vector<8x128xf32>
    %234 = vector.broadcast %232 : vector<1x128xf32> to vector<8x128xf32>
    %235 = arith.mulf %233, %234 : vector<8x128xf32>
    %cst_118 = arith.constant 1.000000e+00 : f32
    %236 = vector.broadcast %cst_118 : f32 to vector<8x128xf32>
    %237 = arith.subf %236, %235 : vector<8x128xf32>
    %cst_119 = arith.constant 0.000000e+00 : f32
    %238 = vector.broadcast %cst_119 : f32 to vector<8x128xf32>
    %239 = arith.maximumf %237, %238 : vector<8x128xf32>
    %240 = arith.addf %230, %239 : vector<8x128xf32>
    %c0_120 = arith.constant 0 : index
    %c24 = arith.constant 24 : index
    %241 = vector.load %arg3[%c0_120, %c24] : memref<8x32xf32, #tpu.memory_space<vmem>>, vector<8x1xf32>
    %c24_121 = arith.constant 24 : index
    %c0_122 = arith.constant 0 : index
    %242 = vector.load %arg4[%c24_121, %c0_122] : memref<32x128xf32, #tpu.memory_space<vmem>>, vector<1x128xf32>
    %243 = vector.broadcast %241 : vector<8x1xf32> to vector<8x128xf32>
    %244 = vector.broadcast %242 : vector<1x128xf32> to vector<8x128xf32>
    %245 = arith.mulf %243, %244 : vector<8x128xf32>
    %cst_123 = arith.constant 1.000000e+00 : f32
    %246 = vector.broadcast %cst_123 : f32 to vector<8x128xf32>
    %247 = arith.subf %246, %245 : vector<8x128xf32>
    %cst_124 = arith.constant 0.000000e+00 : f32
    %248 = vector.broadcast %cst_124 : f32 to vector<8x128xf32>
    %249 = arith.maximumf %247, %248 : vector<8x128xf32>
    %250 = arith.addf %240, %249 : vector<8x128xf32>
    %c0_125 = arith.constant 0 : index
    %c25 = arith.constant 25 : index
    %251 = vector.load %arg3[%c0_125, %c25] : memref<8x32xf32, #tpu.memory_space<vmem>>, vector<8x1xf32>
    %c25_126 = arith.constant 25 : index
    %c0_127 = arith.constant 0 : index
    %252 = vector.load %arg4[%c25_126, %c0_127] : memref<32x128xf32, #tpu.memory_space<vmem>>, vector<1x128xf32>
    %253 = vector.broadcast %251 : vector<8x1xf32> to vector<8x128xf32>
    %254 = vector.broadcast %252 : vector<1x128xf32> to vector<8x128xf32>
    %255 = arith.mulf %253, %254 : vector<8x128xf32>
    %cst_128 = arith.constant 1.000000e+00 : f32
    %256 = vector.broadcast %cst_128 : f32 to vector<8x128xf32>
    %257 = arith.subf %256, %255 : vector<8x128xf32>
    %cst_129 = arith.constant 0.000000e+00 : f32
    %258 = vector.broadcast %cst_129 : f32 to vector<8x128xf32>
    %259 = arith.maximumf %257, %258 : vector<8x128xf32>
    %260 = arith.addf %250, %259 : vector<8x128xf32>
    %c0_130 = arith.constant 0 : index
    %c26 = arith.constant 26 : index
    %261 = vector.load %arg3[%c0_130, %c26] : memref<8x32xf32, #tpu.memory_space<vmem>>, vector<8x1xf32>
    %c26_131 = arith.constant 26 : index
    %c0_132 = arith.constant 0 : index
    %262 = vector.load %arg4[%c26_131, %c0_132] : memref<32x128xf32, #tpu.memory_space<vmem>>, vector<1x128xf32>
    %263 = vector.broadcast %261 : vector<8x1xf32> to vector<8x128xf32>
    %264 = vector.broadcast %262 : vector<1x128xf32> to vector<8x128xf32>
    %265 = arith.mulf %263, %264 : vector<8x128xf32>
    %cst_133 = arith.constant 1.000000e+00 : f32
    %266 = vector.broadcast %cst_133 : f32 to vector<8x128xf32>
    %267 = arith.subf %266, %265 : vector<8x128xf32>
    %cst_134 = arith.constant 0.000000e+00 : f32
    %268 = vector.broadcast %cst_134 : f32 to vector<8x128xf32>
    %269 = arith.maximumf %267, %268 : vector<8x128xf32>
    %270 = arith.addf %260, %269 : vector<8x128xf32>
    %c0_135 = arith.constant 0 : index
    %c27 = arith.constant 27 : index
    %271 = vector.load %arg3[%c0_135, %c27] : memref<8x32xf32, #tpu.memory_space<vmem>>, vector<8x1xf32>
    %c27_136 = arith.constant 27 : index
    %c0_137 = arith.constant 0 : index
    %272 = vector.load %arg4[%c27_136, %c0_137] : memref<32x128xf32, #tpu.memory_space<vmem>>, vector<1x128xf32>
    %273 = vector.broadcast %271 : vector<8x1xf32> to vector<8x128xf32>
    %274 = vector.broadcast %272 : vector<1x128xf32> to vector<8x128xf32>
    %275 = arith.mulf %273, %274 : vector<8x128xf32>
    %cst_138 = arith.constant 1.000000e+00 : f32
    %276 = vector.broadcast %cst_138 : f32 to vector<8x128xf32>
    %277 = arith.subf %276, %275 : vector<8x128xf32>
    %cst_139 = arith.constant 0.000000e+00 : f32
    %278 = vector.broadcast %cst_139 : f32 to vector<8x128xf32>
    %279 = arith.maximumf %277, %278 : vector<8x128xf32>
    %280 = arith.addf %270, %279 : vector<8x128xf32>
    %c0_140 = arith.constant 0 : index
    %c28 = arith.constant 28 : index
    %281 = vector.load %arg3[%c0_140, %c28] : memref<8x32xf32, #tpu.memory_space<vmem>>, vector<8x1xf32>
    %c28_141 = arith.constant 28 : index
    %c0_142 = arith.constant 0 : index
    %282 = vector.load %arg4[%c28_141, %c0_142] : memref<32x128xf32, #tpu.memory_space<vmem>>, vector<1x128xf32>
    %283 = vector.broadcast %281 : vector<8x1xf32> to vector<8x128xf32>
    %284 = vector.broadcast %282 : vector<1x128xf32> to vector<8x128xf32>
    %285 = arith.mulf %283, %284 : vector<8x128xf32>
    %cst_143 = arith.constant 1.000000e+00 : f32
    %286 = vector.broadcast %cst_143 : f32 to vector<8x128xf32>
    %287 = arith.subf %286, %285 : vector<8x128xf32>
    %cst_144 = arith.constant 0.000000e+00 : f32
    %288 = vector.broadcast %cst_144 : f32 to vector<8x128xf32>
    %289 = arith.maximumf %287, %288 : vector<8x128xf32>
    %290 = arith.addf %280, %289 : vector<8x128xf32>
    %c0_145 = arith.constant 0 : index
    %c29 = arith.constant 29 : index
    %291 = vector.load %arg3[%c0_145, %c29] : memref<8x32xf32, #tpu.memory_space<vmem>>, vector<8x1xf32>
    %c29_146 = arith.constant 29 : index
    %c0_147 = arith.constant 0 : index
    %292 = vector.load %arg4[%c29_146, %c0_147] : memref<32x128xf32, #tpu.memory_space<vmem>>, vector<1x128xf32>
    %293 = vector.broadcast %291 : vector<8x1xf32> to vector<8x128xf32>
    %294 = vector.broadcast %292 : vector<1x128xf32> to vector<8x128xf32>
    %295 = arith.mulf %293, %294 : vector<8x128xf32>
    %cst_148 = arith.constant 1.000000e+00 : f32
    %296 = vector.broadcast %cst_148 : f32 to vector<8x128xf32>
    %297 = arith.subf %296, %295 : vector<8x128xf32>
    %cst_149 = arith.constant 0.000000e+00 : f32
    %298 = vector.broadcast %cst_149 : f32 to vector<8x128xf32>
    %299 = arith.maximumf %297, %298 : vector<8x128xf32>
    %300 = arith.addf %290, %299 : vector<8x128xf32>
    %c0_150 = arith.constant 0 : index
    %c30 = arith.constant 30 : index
    %301 = vector.load %arg3[%c0_150, %c30] : memref<8x32xf32, #tpu.memory_space<vmem>>, vector<8x1xf32>
    %c30_151 = arith.constant 30 : index
    %c0_152 = arith.constant 0 : index
    %302 = vector.load %arg4[%c30_151, %c0_152] : memref<32x128xf32, #tpu.memory_space<vmem>>, vector<1x128xf32>
    %303 = vector.broadcast %301 : vector<8x1xf32> to vector<8x128xf32>
    %304 = vector.broadcast %302 : vector<1x128xf32> to vector<8x128xf32>
    %305 = arith.mulf %303, %304 : vector<8x128xf32>
    %cst_153 = arith.constant 1.000000e+00 : f32
    %306 = vector.broadcast %cst_153 : f32 to vector<8x128xf32>
    %307 = arith.subf %306, %305 : vector<8x128xf32>
    %cst_154 = arith.constant 0.000000e+00 : f32
    %308 = vector.broadcast %cst_154 : f32 to vector<8x128xf32>
    %309 = arith.maximumf %307, %308 : vector<8x128xf32>
    %310 = arith.addf %300, %309 : vector<8x128xf32>
    %c0_155 = arith.constant 0 : index
    %c31 = arith.constant 31 : index
    %311 = vector.load %arg3[%c0_155, %c31] : memref<8x32xf32, #tpu.memory_space<vmem>>, vector<8x1xf32>
    %c31_156 = arith.constant 31 : index
    %c0_157 = arith.constant 0 : index
    %312 = vector.load %arg4[%c31_156, %c0_157] : memref<32x128xf32, #tpu.memory_space<vmem>>, vector<1x128xf32>
    %313 = vector.broadcast %311 : vector<8x1xf32> to vector<8x128xf32>
    %314 = vector.broadcast %312 : vector<1x128xf32> to vector<8x128xf32>
    %315 = arith.mulf %313, %314 : vector<8x128xf32>
    %cst_158 = arith.constant 1.000000e+00 : f32
    %316 = vector.broadcast %cst_158 : f32 to vector<8x128xf32>
    %317 = arith.subf %316, %315 : vector<8x128xf32>
    %cst_159 = arith.constant 0.000000e+00 : f32
    %318 = vector.broadcast %cst_159 : f32 to vector<8x128xf32>
    %319 = arith.maximumf %317, %318 : vector<8x128xf32>
    %320 = arith.addf %310, %319 : vector<8x128xf32>
    %c0_i32 = arith.constant 0 : i32
    %321 = arith.cmpi eq, %arg2, %c0_i32 : i32
    %322 = arith.extui %321 : i1 to i32
    %c0_i32_160 = arith.constant 0 : i32
    %323 = arith.cmpi ne, %322, %c0_i32_160 : i32
    scf.if %323 {
      %c0_163 = arith.constant 0 : index
      %c0_164 = arith.constant 0 : index
      %327 = vector.load %arg5[%c0_163, %c0_164] : memref<8x128xf32, #tpu.memory_space<vmem>>, vector<8x128xf32>
      tpu.vector_store %arg5[%c0_163, %c0_164], %320 {strides = array<i32>} : memref<8x128xf32, #tpu.memory_space<vmem>>, vector<8x128xf32>,
    } else {
    }
    %c0_i32_161 = arith.constant 0 : i32
    %324 = arith.cmpi sgt, %arg2, %c0_i32_161 : i32
    %325 = arith.extui %324 : i1 to i32
    %c0_i32_162 = arith.constant 0 : i32
    %326 = arith.cmpi ne, %325, %c0_i32_162 : i32
    scf.if %326 {
      %c0_163 = arith.constant 0 : index
      %c0_164 = arith.constant 0 : index
      %327 = vector.load %arg5[%c0_163, %c0_164] : memref<8x128xf32, #tpu.memory_space<vmem>>, vector<8x128xf32>
      %328 = arith.addf %327, %320 : vector<8x128xf32>
      %c0_165 = arith.constant 0 : index
      %c0_166 = arith.constant 0 : index
      %329 = vector.load %arg5[%c0_165, %c0_166] : memref<8x128xf32, #tpu.memory_space<vmem>>, vector<8x128xf32>
      tpu.vector_store %arg5[%c0_165, %c0_166], %328 {strides = array<i32>} : memref<8x128xf32, #tpu.memory_space<vmem>>, vector<8x128xf32>,
    } else {
    }
    return
  }
  func.func @transform_0(%arg0: i32, %arg1: i32, %arg2: i32) -> (i32, i32) {
    %c0_i32 = arith.constant 0 : i32
    return %arg0, %arg2 : i32, i32
  }
  func.func @transform_1(%arg0: i32, %arg1: i32, %arg2: i32) -> (i32, i32) {
    %c0_i32 = arith.constant 0 : i32
    return %arg2, %arg1 : i32, i32
  }
  func.func @transform_2(%arg0: i32, %arg1: i32, %arg2: i32) -> (i32, i32) {
    %c0_i32 = arith.constant 0 : i32
    return %arg0, %arg1 : i32, i32
  }
}

</mosaic_0001>

<bundles_post_ra>
// kernel: tpu_custom_call.1
= control target key start
LH: loop header
LB: loop body
LE: loop exit
PB: predicated region body
PF: predicated region fallthrough
CT: control target
= control target key end

     0   :  { %7 = vsyncpa [#allocation3], 0  ;;  %s1336_s0 = inlined_call_operand.hbm [shape: f32[16,32], index: 0, kind: input, shape index: {}]   ;;  %s1337_s1 = inlined_call_operand.hbm [shape: f32[32,128], index: 1, kind: input, shape index: {}]   ;;  %s1338_s2 = inlined_call_operand.hbm [shape: f32[16,128], index: 2, kind: output, shape index: {}]  }
   0x1   :  { %9 = vsyncpa [#allocation3 + $0x1], 0 }
   0x2   :  { %10 = vsyncpa [#allocation6], 0 }
   0x3   :  { %11 = vsyncpa [#allocation4], 0 }
   0x4   :  { %13 = vsyncpa [#allocation4 + $0x1], 0  ;;  %s1131_s9 = smov 0   ;;  %s1133_s10 = smov 0  }
   0x5   :  { %s1135_s11 = smov 0   ;;  %s1137_s12 = smov 0  }
   0x6   :  { %s1139_s13 = smov 0   ;;  %s1141_s14 = smov 0  }
   0x7 LB: > { %s752_s15 = sadd.s32 4294967295, %s1077_s14   ;;  %s753_s16 = sadd.s32 4294967294, %s1077_s14   ;;  %s1077_s14 = sphi %s1141_s14, %s19_s14   ;;  %s1073_s13 = sphi %s1139_s13, %s1356_s13   ;;  %s1069_s12 = sphi %s1137_s12, %s1355_s12   ;;  %s1065_s11 = sphi %s1135_s11, %s1354_s11   ;;  %s1061_s10 = sphi %s1133_s10, %s1353_s10   ;;  %s1057_s9 = sphi %s1131_s9, %s1352_s9  }
   0x8   : > { %p60_p0 = scmp.ne.s32.totalorder %s1061_s10, %s1057_s9  ;;  %p1165_p1 = scmp.eq.s32.totalorder %s752_s15, 0 }
   0x9   : > { %p1169_p2 = scmp.eq.s32.totalorder %s752_s15, 1  ;;  %p120_p3 = scmp.eq.s32.totalorder %s753_s16, 1 }
   0xa   : > { %p1175_p4 = por %p1165_p1, %p60_p0  ;;  %p754_p5 = scmp.ge.s32.totalorder %s1077_s14, 1 }
   0xb   : > { %p1180_p6 = por %p120_p3, %p60_p0  ;;  %p127_p7 = scmp.lt.s32.totalorder %s1077_s14, 3 }
   0xc   : > { %s1342_s19 = scalar_select %p1175_p4, 1, 0 }
   0xd   : > { %s1343_s20 = scalar_select %p1180_p6, 1, 0 }
   0xe   : > { %p1185_p8 = pnand %p754_p5, %p127_p7  ;;  %s1079_s22 = smov [#allocation5]  }
   0xf   : > { %s143_s23 = sshll.u32 %s1079_s22, 4  ;;  %s38_s25 = sadd.s32 1, %s1073_s13  ;;  %s144_s23 = int_to_ptr.vmem [resolvable:$true] %s143_s23 }
  0x10   : > { %p807_p9 = pneg %p1185_p8  ;;  %s950_s26 = scalar_lea.vmem %s144_s23, 512 }
  0x11   : > { %p951_p13 = scmp.ne.s32.totalorder %s144_s23, %s950_s26  ;;  %p958_p5 = scmp.lt.s32.totalorder %s144_s23, %s144_s23 }
  0x12   : > { %p1194_p11 = pnand %p807_p9, %p1165_p1  ;;  %p959_p7 = scmp.lt.s32.totalorder %s950_s26, %s950_s26 }
  0x14   : > { %p941_p12 = pneg %p1194_p11  ;;  %p960_p6 = por %p959_p7, %p958_p5 }
  0x16   : > { %p953_p0 = pnand %p951_p13, %p941_p12 }
  0x18   : > { %p954_p3 = pneg %p953_p0 }
  0x1a   : > { %p961_p4 = pnand %p960_p6, %p954_p3 }
  0x1c   : > { %964 = shalt.err (!%p961_p4)
}
  0x1d   : > { %s1080_s27 = smov 128   ;;  %s1081_s28 = smov 8  }
  0x1e   : > { %810 = dma.hbm_to_vmem [thread:$0]  (!%p1194_p11), %s1337_s1, 512, %s144_s23, [#allocation6], %s1080_s27, %s1080_s27, %s1081_s28  }
  0x1f   : > { %p40_p6 = scmp.ge.s32.totalorder %s38_s25, 2  ;;  %s47_s3 = sadd.s32 1, %s1065_s11 }
  0x20   : > { %p54_p4 = scmp.ne.s32.totalorder %s1065_s11, %s1061_s10  ;;  %p55_p9 = scmp.eq.s32.totalorder %s1077_s14, 0 }
  0x21   : > { %s1358_s25 = smov (%p40_p6, %s38_s25), 0  ;;  %p820_p0 = scmp.lt.s32.totalorder %s1077_s14, 2 }
  0x22   : > { %p1212_p12 = por %p55_p9, %p54_p4  ;;  %p1218_p13 = por %p1169_p2, %p54_p4 }
  0x23   : > { %s42_s6 = ssub.s32 %s1073_s13, %s1358_s25  ;;  %s157_s7 = sand.u32 1, %s1065_s11  }
  0x24   : > { %p45_p11 = scmp.eq.s32.totalorder %s42_s6, 0  ;;  %s757_s8 = sshll.u32 %s157_s7, 3 }
  0x25   : > { %s758_s16 = sshll.u32 %s1073_s13, 7  ;;  %s161_s26 = scalar_lea.vmem [#allocation2], %s757_s8 }
  0x26   : > { %s1227_s15 = scalar_select %p45_p11, %s1065_s11, %s47_s3  }
  0x27   : > { %s167_s24 = scalar_lea.hbm %s1336_s0, %s758_s16  ;;  %s169_s27 = sshll.u32 %s161_s26, 4  ;;  %s170_s27 = int_to_ptr.vmem [resolvable:$true] %s169_s27 }
  0x28   : > { %p1235_p2 = pnand %p820_p0, %p1212_p12  ;;  %s158_s28 = scalar_lea.sflag [#allocation3], %s157_s7 }
  0x29   : > { %s978_s29 = scalar_lea.vmem %s170_s27, 128  ;;  %s1082_s30 = smov [#allocation2]  }
  0x2a   : > { %p967_p3 = pneg %p1235_p2  ;;  %p979_p5 = scmp.ne.s32.totalorder %s170_s27, %s978_s29 }
  0x2b   : > { %s983_s3 = sshll.u32 %s1082_s30, 4  ;;  %s984_s3 = int_to_ptr.vmem [resolvable:$false] %s983_s3 }
  0x2c   : > { %p981_p7 = pnand %p979_p5, %p967_p3  ;;  %s985_s6 = scalar_lea.vmem %s984_s3, 256 }
  0x2d   : > { %p986_p4 = scmp.lt.s32.totalorder %s170_s27, %s984_s3  ;;  %p987_p9 = scmp.lt.s32.totalorder %s985_s6, %s978_s29 }
  0x2e   : > { %p982_p6 = pneg %p981_p7 }
  0x2f   : > { %p988_p11 = por %p987_p9, %p986_p4 }
  0x31   : > { %p989_p10 = pnand %p988_p11, %p982_p6 }
  0x33   : > { %992 = shalt.err (!%p989_p10)
}
  0x34   : > { %814 = dma.hbm_to_vmem [thread:$0]  (!%p1235_p2), %s167_s24, 128, %s170_s27, %s158_s28  }
  0x35   : > { %178 = sbr.rel (%p1185_p8) target bundleno = 308 (0x134), region = 28  ;;  %s1246_s4 = sand.u32 (!%p1185_p8), 1, %s1061_s10  }
  0x36   : > { %s760_s7 = sshll.u32 (!%p1185_p8), %s1246_s4, 3  ;;  %s181_s8 = scalar_lea.sflag (!%p1185_p8), [#allocation3], %s1246_s4 }
  0x37   : > { %s184_s16 = scalar_lea.vmem (!%p1185_p8), [#allocation2], %s760_s7  ;;  %p1349_p12 = scmp.ne.s32.totalorder (!%p1185_p8), %s1342_s19, 0 }
  0x3a   : > { %1044 = dma.done.wait (%p1349_p12), %s181_s8, 128  }
  0x3b   : > { %1046 = vsyncadd (%p1349_p12), %s181_s8, 4294967168 }
  0x3c   : > { %1048 = dma.done.wait (%p1165_p1), [#allocation6], 512  }
  0x3d   : > { %1050 = vsyncadd (%p1165_p1), [#allocation6], 4294966784  ;;  %v1083_v0 = vmov 2   ;;  %v1084_v1 = vmov 0   ;;  %v1260_v2 = vld [vmem:[%s184_s16] sm:$0xff]  ;;  %v1085_v3 = vmov 3  }
  0x3e   : > { %908 = vset.pattern.permute.xlu1 %v1083_v0  ;;  %906 = vset.pattern.permute.xlu0 %v1084_v1  ;;  %v1086_v4 = vmov 1   ;;  %v1087_v5 = vmov 4   ;;  %v1088_v6 = vmov 5   ;;  %v1089_v7 = vmov 6   ;;  %v763_v33 = vld [vmem:[#allocation5] ss:$0 sm:$0xff] }
  0x3f   : > { %240 = vperm.xlu1 %908, %v1260_v2   ;;  %214 = vperm.xlu0 %906, %v1260_v2   ;;  %v1090_v8 = vmov 8   ;;  %v1091_v9 = vmov 7   ;;  %v1092_v10 = vmov 11   ;;  %v1093_v11 = vmov 9   ;;  %v765_v36 = vld [vmem:[#allocation5 + $0x2] ss:$0 sm:$0xff] }
  0x40   : > { %v1094_v12 = vmov 14   ;;  %v1095_v13 = vmov 10   ;;  %v1096_v14 = vmov 17   ;;  %v1097_v15 = vmov 12   ;;  %v766_v38 = vld [vmem:[#allocation5 + $0x3] ss:$0 sm:$0xff] }
  0x41   : > { %v1098_v16 = vmov 20   ;;  %v1099_v17 = vmov 13   ;;  %v1100_v18 = vmov 23   ;;  %v1101_v19 = vmov 15   ;;  %v764_v39 = vld [vmem:[#allocation5 + $0x1] ss:$0 sm:$0xff] }
  0x42   : > { %v1102_v20 = vmov 26   ;;  %v1103_v21 = vmov 16   ;;  %v1104_v22 = vmov 29   ;;  %v1105_v23 = vmov 18   ;;  %v767_v46 = vld [vmem:[#allocation5 + $0x4] ss:$0 sm:$0xff] }
  0x43   : > { %909 = vset.pattern.permute.xlu1 %v1085_v3  ;;  %907 = vset.pattern.permute.xlu0 %v1086_v4  ;;  %v1106_v24 = vmov 31   ;;  %v1107_v25 = vmov 19   ;;  %v1108_v26 = vmov 21   ;;  %v1109_v27 = vmov 22   ;;  %v768_v50 = vld [vmem:[#allocation5 + $0x5] ss:$0 sm:$0xff] }
  0x44   : > { %253 = vperm.xlu1 %909, %v1260_v2   ;;  %227 = vperm.xlu0 %907, %v1260_v2   ;;  %v1110_v28 = vmov 24   ;;  %v1111_v29 = vmov 25   ;;  %v1112_v30 = vmov 27   ;;  %v1113_v31 = vmov 28   ;;  %v769_v61 = vld [vmem:[#allocation5 + $0x6] ss:$0 sm:$0xff] }
  0x45   : > { %v1114_v32 = vmov 30   ;;  %v771_v4 = vld [vmem:[#allocation5 + $0x8] ss:$0 sm:$0xff]  ;;  %s796_s17 = sshll.u32 %s1069_s12, 7  ;;  %s208_s19 = scalar_lea.vmem [#allocation7], %s760_s7 }
  0x46   : > { %s655_s21 = sshll.u32 %s208_s19, 4  ;;  %s653_s24 = scalar_lea.hbm %s1338_s2, %s796_s17  ;;  %s656_s21 = int_to_ptr.vmem [resolvable:$true] %s655_s21 }
  0x47   : > { %s641_s26 = scalar_lea.sflag [#allocation4], %s1246_s4  ;;  %s993_s27 = scalar_lea.vmem %s656_s21, 128 }
  0x48   : > { %910 = vset.pattern.permute.xlu1 %v1087_v5  ;;  %911 = vset.pattern.permute.xlu0 %v1088_v6  ;;  %p994_p1 = scmp.ne.s32.totalorder %s656_s21, %s993_s27  ;;  %s1115_s18 = smov [#allocation7]  }
  0x49   : > { %266 = vperm.xlu1 %910, %v1260_v2   ;;  %279 = vperm.xlu0 %911, %v1260_v2   ;;  %s997_s12 = sshll.u32 %s1115_s18, 4  ;;  %s998_s12 = int_to_ptr.vmem [resolvable:$false] %s997_s12 }
  0x4a   : > { %p995_p8 = pnand %p994_p1, %p1218_p13  ;;  %s999_s28 = scalar_lea.vmem %s998_s12, 256 }
  0x4b   : > { %p1000_p0 = scmp.lt.s32.totalorder %s656_s21, %s998_s12  ;;  %p1001_p2 = scmp.lt.s32.totalorder %s999_s28, %s993_s27 }
  0x4c   : > { %p996_p10 = pneg %p995_p8 }
  0x4d   : > { %912 = vset.pattern.permute.xlu1 %v1089_v7  ;;  %914 = vset.pattern.permute.xlu0 %v1090_v8  ;;  %p1002_p3 = por %p1001_p2, %p1000_p0 }
  0x4e   : > { %292 = vperm.xlu1 %912, %v1260_v2   ;;  %318 = vperm.xlu0 %914, %v1260_v2  }
  0x4f   : > { %p1003_p5 = pnand %p1002_p3, %p996_p10 }
  0x52   : > { %913 = vset.pattern.permute.xlu1 %v1091_v9  ;;  %917 = vset.pattern.permute.xlu0 %v1092_v10  ;;  %v770_v9 = vld [vmem:[#allocation5 + $0x7] ss:$0 sm:$0xff] }
  0x53   : > { %305 = vperm.xlu1 %913, %v1260_v2   ;;  %357 = vperm.xlu0 %917, %v1260_v2  }
  0x57   : > { %915 = vset.pattern.permute.xlu1 %v1093_v11  ;;  %920 = vset.pattern.permute.xlu0 %v1094_v12 }
  0x58   : > { %331 = vperm.xlu1 %915, %v1260_v2   ;;  %396 = vperm.xlu0 %920, %v1260_v2  }
  0x5c   : > { %916 = vset.pattern.permute.xlu1 %v1095_v13  ;;  %923 = vset.pattern.permute.xlu0 %v1096_v14 }
  0x5d   : > { %344 = vperm.xlu1 %916, %v1260_v2   ;;  %435 = vperm.xlu0 %923, %v1260_v2  }
  0x61   : > { %918 = vset.pattern.permute.xlu1 %v1097_v15  ;;  %926 = vset.pattern.permute.xlu0 %v1098_v16 }
  0x62   : > { %370 = vperm.xlu1 %918, %v1260_v2   ;;  %474 = vperm.xlu0 %926, %v1260_v2  }
  0x66   : > { %919 = vset.pattern.permute.xlu1 %v1099_v17  ;;  %929 = vset.pattern.permute.xlu0 %v1100_v18  ;;  %v772_v17 = vld [vmem:[#allocation5 + $0x9] ss:$0 sm:$0xff] }
  0x67   : > { %383 = vperm.xlu1 %919, %v1260_v2   ;;  %513 = vperm.xlu0 %929, %v1260_v2  }
  0x6b   : > { %921 = vset.pattern.permute.xlu1 %v1101_v19  ;;  %932 = vset.pattern.permute.xlu0 %v1102_v20 }
  0x6c   : > { %409 = vperm.xlu1 %921, %v1260_v2   ;;  %552 = vperm.xlu0 %932, %v1260_v2  }
  0x70   : > { %922 = vset.pattern.permute.xlu1 %v1103_v21  ;;  %935 = vset.pattern.permute.xlu0 %v1104_v22  ;;  %v774_v22 = vld [vmem:[#allocation5 + $0xb] ss:$0 sm:$0xff] }
  0x71   : > { %422 = vperm.xlu1 %922, %v1260_v2   ;;  %591 = vperm.xlu0 %935, %v1260_v2  }
  0x75   : > { %924 = vset.pattern.permute.xlu1 %v1105_v23  ;;  %938 = vset.pattern.permute.xlu0 %v1106_v24 }
  0x76   : > { %448 = vperm.xlu1 %924, %v1260_v2  }
  0x7a   : > { %925 = vset.pattern.permute.xlu1 %v1107_v25 }
  0x7b   : > { %461 = vperm.xlu1 %925, %v1260_v2  }
  0x7f   : > { %927 = vset.pattern.permute.xlu1 %v1108_v26 }
  0x80   : > { %487 = vperm.xlu1 %927, %v1260_v2  }
  0x84   : > { %928 = vset.pattern.permute.xlu1 %v1109_v27  ;;  %v773_v27 = vld [vmem:[#allocation5 + $0xa] ss:$0 sm:$0xff] }
  0x85   : > { %500 = vperm.xlu1 %928, %v1260_v2  }
  0x89   : > { %930 = vset.pattern.permute.xlu1 %v1110_v28 }
  0x8a   : > { %526 = vperm.xlu1 %930, %v1260_v2  }
  0x8e   : > { %931 = vset.pattern.permute.xlu1 %v1111_v29 }
  0x8f   : > { %539 = vperm.xlu1 %931, %v1260_v2  }
  0x93   : > { %933 = vset.pattern.permute.xlu1 %v1112_v30 }
  0x94   : > { %565 = vperm.xlu1 %933, %v1260_v2  }
  0x98   : > { %934 = vset.pattern.permute.xlu1 %v1113_v31 }
  0x99   : > { %578 = vperm.xlu1 %934, %v1260_v2  }
  0x9d   : > { %936 = vset.pattern.permute.xlu1 %v1114_v32 }
  0x9e   : > { %604 = vperm.xlu1 %936, %v1260_v2  }
  0xa2   : > { %937 = vset.pattern.permute.xlu1 %v1106_v24 }
  0xa3   : > { %617 = vperm.xlu1 %937, %v1260_v2  }
  0xba   : > { %v241_v34 = vpop.permute.xlu1 %240  ;;  %v215_v35 = vpop.permute.xlu0 %214 }
  0xbb   : > { %v221_v37 = vmul.f32 %v763_v33, %v215_v35  ;;  %v247_v40 = vmul.f32 %v765_v36, %v241_v34  ;;  %v775_v35 = vld [vmem:[#allocation5 + $0xc] ss:$0 sm:$0xff] }
  0xbd   : > { %v222_v41 = vsub.f32 1.0, %v221_v37  ;;  %v248_v47 = vsub.f32 1.0, %v247_v40  ;;  %v777_v40 = vld [vmem:[#allocation5 + $0xe] ss:$0 sm:$0xff] }
  0xbf   : > { %v254_v42 = vpop.permute.xlu1 %253  ;;  %v228_v43 = vpop.permute.xlu0 %227  ;;  %v223_v48 = vmax.f32 %v222_v41, 0.0  ;;  %v249_v57 = vmax.f32 %v248_v47, 0.0 }
  0xc0   : > { %v260_v44 = vmul.f32 %v766_v38, %v254_v42  ;;  %v234_v45 = vmul.f32 %v764_v39, %v228_v43 }
  0xc2   : > { %v235_v49 = vsub.f32 1.0, %v234_v45  ;;  %v261_v51 = vsub.f32 1.0, %v260_v44  ;;  %v776_v45 = vld [vmem:[#allocation5 + $0xd] ss:$0 sm:$0xff] }
  0xc4   : > { %v236_v52 = vmax.f32 %v235_v49, 0.0  ;;  %v267_v53 = vpop.permute.xlu1 %266  ;;  %v280_v54 = vpop.permute.xlu0 %279  ;;  %v262_v62 = vmax.f32 %v261_v51, 0.0 }
  0xc5   : > { %v273_v55 = vmul.f32 %v767_v46, %v267_v53  ;;  %v286_v56 = vmul.f32 %v768_v50, %v280_v54  ;;  %v778_v53 = vld [vmem:[#allocation5 + $0xf] ss:$0 sm:$0xff] }
  0xc6   : > { %v237_v58 = vadd.f32 %v236_v52, %v223_v48 }
  0xc7   : > { %v274_v59 = vsub.f32 1.0, %v273_v55  ;;  %v287_v60 = vsub.f32 1.0, %v286_v56 }
  0xc8   : > { %v250_v63 = vadd.f32 %v249_v57, %v237_v58  ;;  %v780_v58 = vld [vmem:[#allocation5 + $0x11] ss:$0 sm:$0xff] }
  0xc9   : > { %v275_v0 = vmax.f32 %v274_v59, 0.0  ;;  %v293_v1 = vpop.permute.xlu1 %292  ;;  %v319_v5 = vpop.permute.xlu0 %318  ;;  %v288_v6 = vmax.f32 %v287_v60, 0.0 }
  0xca   : > { %v263_v2 = vadd.f32 %v262_v62, %v250_v63  ;;  %v299_v3 = vmul.f32 %v769_v61, %v293_v1  ;;  %v325_v10 = vmul.f32 %v771_v4, %v319_v5  ;;  %v779_v63 = vld [vmem:[#allocation5 + $0x10] ss:$0 sm:$0xff] }
  0xcc   : > { %v276_v7 = vadd.f32 %v275_v0, %v263_v2  ;;  %v300_v8 = vsub.f32 1.0, %v299_v3  ;;  %v326_v16 = vsub.f32 1.0, %v325_v10 }
  0xce   : > { %v306_v11 = vpop.permute.xlu1 %305  ;;  %v289_v12 = vadd.f32 %v288_v6, %v276_v7  ;;  %v301_v13 = vmax.f32 %v300_v8, 0.0  ;;  %v358_v23 = vpop.permute.xlu0 %357  ;;  %v327_v25 = vmax.f32 %v326_v16, 0.0  ;;  %v781_v7 = vld [vmem:[#allocation5 + $0x12] ss:$0 sm:$0xff] }
  0xcf   : > { %v312_v14 = vmul.f32 %v770_v9, %v306_v11  ;;  %v364_v28 = vmul.f32 %v774_v22, %v358_v23 }
  0xd0   : > { %v302_v18 = vadd.f32 %v301_v13, %v289_v12  ;;  %v783_v12 = vld [vmem:[#allocation5 + $0x14] ss:$0 sm:$0xff] }
  0xd1   : > { %v313_v15 = vsub.f32 1.0, %v312_v14  ;;  %v365_v34 = vsub.f32 1.0, %v364_v28 }
  0xd3   : > { %v314_v19 = vmax.f32 %v313_v15, 0.0  ;;  %v332_v20 = vpop.permute.xlu1 %331  ;;  %v397_v41 = vpop.permute.xlu0 %396  ;;  %v366_v43 = vmax.f32 %v365_v34, 0.0 }
  0xd4   : > { %v338_v21 = vmul.f32 %v772_v17, %v332_v20  ;;  %v403_v46 = vmul.f32 %v777_v40, %v397_v41  ;;  %v782_v17 = vld [vmem:[#allocation5 + $0x13] ss:$0 sm:$0xff] }
  0xd5   : > { %v315_v24 = vadd.f32 %v314_v19, %v302_v18 }
  0xd6   : > { %v339_v26 = vsub.f32 1.0, %v338_v21  ;;  %v404_v52 = vsub.f32 1.0, %v403_v46 }
  0xd7   : > { %v328_v30 = vadd.f32 %v327_v25, %v315_v24  ;;  %v784_v25 = vld [vmem:[#allocation5 + $0x15] ss:$0 sm:$0xff] }
  0xd8   : > { %v345_v29 = vpop.permute.xlu1 %344  ;;  %v340_v31 = vmax.f32 %v339_v26, 0.0  ;;  %v436_v59 = vpop.permute.xlu0 %435  ;;  %v405_v61 = vmax.f32 %v404_v52, 0.0 }
  0xd9   : > { %v351_v32 = vmul.f32 %v773_v27, %v345_v29  ;;  %v442_v0 = vmul.f32 %v780_v58, %v436_v59 }
  0xda   : > { %v341_v36 = vadd.f32 %v340_v31, %v328_v30  ;;  %v786_v30 = vld [vmem:[#allocation5 + $0x17] ss:$0 sm:$0xff] }
  0xdb   : > { %v352_v33 = vsub.f32 1.0, %v351_v32  ;;  %v443_v6 = vsub.f32 1.0, %v442_v0 }
  0xdd   : > { %v353_v37 = vmax.f32 %v352_v33, 0.0  ;;  %v371_v38 = vpop.permute.xlu1 %370  ;;  %v475_v13 = vpop.permute.xlu0 %474  ;;  %v444_v15 = vmax.f32 %v443_v6, 0.0 }
  0xde   : > { %v377_v39 = vmul.f32 %v775_v35, %v371_v38  ;;  %v481_v18 = vmul.f32 %v783_v12, %v475_v13  ;;  %v785_v35 = vld [vmem:[#allocation5 + $0x16] ss:$0 sm:$0xff] }
  0xdf   : > { %v354_v42 = vadd.f32 %v353_v37, %v341_v36 }
  0xe0   : > { %v378_v44 = vsub.f32 1.0, %v377_v39  ;;  %v482_v24 = vsub.f32 1.0, %v481_v18 }
  0xe1   : > { %v367_v48 = vadd.f32 %v366_v43, %v354_v42  ;;  %v787_v43 = vld [vmem:[#allocation5 + $0x18] ss:$0 sm:$0xff] }
  0xe2   : > { %v384_v47 = vpop.permute.xlu1 %383  ;;  %v379_v49 = vmax.f32 %v378_v44, 0.0  ;;  %v514_v31 = vpop.permute.xlu0 %513  ;;  %v483_v33 = vmax.f32 %v482_v24, 0.0 }
  0xe3   : > { %v390_v50 = vmul.f32 %v776_v45, %v384_v47  ;;  %v520_v36 = vmul.f32 %v786_v30, %v514_v31 }
  0xe4   : > { %v380_v54 = vadd.f32 %v379_v49, %v367_v48  ;;  %v789_v48 = vld [vmem:[#allocation5 + $0x1a] ss:$0 sm:$0xff] }
  0xe5   : > { %v391_v51 = vsub.f32 1.0, %v390_v50  ;;  %v521_v42 = vsub.f32 1.0, %v520_v36 }
  0xe7   : > { %v392_v55 = vmax.f32 %v391_v51, 0.0  ;;  %v410_v56 = vpop.permute.xlu1 %409  ;;  %v553_v49 = vpop.permute.xlu0 %552  ;;  %v522_v51 = vmax.f32 %v521_v42, 0.0 }
  0xe8   : > { %v416_v57 = vmul.f32 %v778_v53, %v410_v56  ;;  %v788_v53 = vld [vmem:[#allocation5 + $0x19] ss:$0 sm:$0xff] }
  0xe9   : > { %v393_v60 = vadd.f32 %v392_v55, %v380_v54  ;;  %v559_v54 = vmul.f32 %v789_v48, %v553_v49 }
  0xea   : > { %v417_v62 = vsub.f32 1.0, %v416_v57 }
  0xeb   : > { %v406_v2 = vadd.f32 %v405_v61, %v393_v60  ;;  %v560_v60 = vsub.f32 1.0, %v559_v54  ;;  %v790_v61 = vld [vmem:[#allocation5 + $0x1b] ss:$0 sm:$0xff] }
  0xec   : > { %v423_v1 = vpop.permute.xlu1 %422  ;;  %v418_v3 = vmax.f32 %v417_v62, 0.0 }
  0xed   : > { %v429_v4 = vmul.f32 %v779_v63, %v423_v1 }
  0xee   : > { %v419_v8 = vadd.f32 %v418_v3, %v406_v2  ;;  %v792_v2 = vld [vmem:[#allocation5 + $0x1d] ss:$0 sm:$0xff]  ;;  %v592_v3 = vpop.permute.xlu0 %591 }
  0xef   : > { %v430_v5 = vsub.f32 1.0, %v429_v4 }
  0xf1   : > { %v431_v9 = vmax.f32 %v430_v5, 0.0  ;;  %v449_v10 = vpop.permute.xlu1 %448  ;;  %v561_v5 = vmax.f32 %v560_v60, 0.0 }
  0xf2   : > { %v455_v11 = vmul.f32 %v781_v7, %v449_v10  ;;  %v791_v7 = vld [vmem:[#allocation5 + $0x1c] ss:$0 sm:$0xff] }
  0xf3   : > { %v432_v14 = vadd.f32 %v431_v9, %v419_v8  ;;  %v598_v8 = vmul.f32 %v792_v2, %v592_v3 }
  0xf4   : > { %v456_v16 = vsub.f32 1.0, %v455_v11 }
  0xf5   : > { %v445_v20 = vadd.f32 %v444_v15, %v432_v14  ;;  %v599_v14 = vsub.f32 1.0, %v598_v8  ;;  %v793_v15 = vld [vmem:[#allocation5 + $0x1e] ss:$0 sm:$0xff] }
  0xf6   : > { %v462_v19 = vpop.permute.xlu1 %461  ;;  %v457_v21 = vmax.f32 %v456_v16, 0.0 }
  0xf7   : > { %v468_v22 = vmul.f32 %v782_v17, %v462_v19 }
  0xf8   : > { %v458_v26 = vadd.f32 %v457_v21, %v445_v20  ;;  %v600_v21 = vmax.f32 %v599_v14, 0.0 }
  0xf9   : > { %v469_v23 = vsub.f32 1.0, %v468_v22 }
  0xfb   : > { %v470_v27 = vmax.f32 %v469_v23, 0.0  ;;  %v488_v28 = vpop.permute.xlu1 %487  ;;  %v794_v23 = vld [vmem:[#allocation5 + $0x1f] ss:$0 sm:$0xff] }
  0xfc   : > { %v494_v29 = vmul.f32 %v784_v25, %v488_v28 }
  0xfd   : > { %v471_v32 = vadd.f32 %v470_v27, %v458_v26 }
  0xfe   : > { %v495_v34 = vsub.f32 1.0, %v494_v29 }
  0xff   : > { %v484_v38 = vadd.f32 %v483_v33, %v471_v32 }
 0x100   : > { %v501_v37 = vpop.permute.xlu1 %500  ;;  %v496_v39 = vmax.f32 %v495_v34, 0.0 }
 0x101   : > { %v507_v40 = vmul.f32 %v785_v35, %v501_v37 }
 0x102   : > { %v497_v44 = vadd.f32 %v496_v39, %v484_v38 }
 0x103   : > { %v508_v41 = vsub.f32 1.0, %v507_v40 }
 0x105   : > { %v509_v45 = vmax.f32 %v508_v41, 0.0  ;;  %v527_v46 = vpop.permute.xlu1 %526 }
 0x106   : > { %v533_v47 = vmul.f32 %v787_v43, %v527_v46 }
 0x107   : > { %v510_v50 = vadd.f32 %v509_v45, %v497_v44 }
 0x108   : > { %v534_v52 = vsub.f32 1.0, %v533_v47 }
 0x109   : > { %v523_v56 = vadd.f32 %v522_v51, %v510_v50 }
 0x10a   : > { %v540_v55 = vpop.permute.xlu1 %539  ;;  %v535_v57 = vmax.f32 %v534_v52, 0.0 }
 0x10b   : > { %v546_v58 = vmul.f32 %v788_v53, %v540_v55 }
 0x10c   : > { %v536_v62 = vadd.f32 %v535_v57, %v523_v56 }
 0x10d   : > { %v547_v59 = vsub.f32 1.0, %v546_v58 }
 0x10f   : > { %v548_v63 = vmax.f32 %v547_v59, 0.0  ;;  %v566_v0 = vpop.permute.xlu1 %565 }
 0x110   : > { %v572_v1 = vmul.f32 %v790_v61, %v566_v0 }
 0x111   : > { %v549_v4 = vadd.f32 %v548_v63, %v536_v62 }
 0x112   : > { %v573_v6 = vsub.f32 1.0, %v572_v1 }
 0x113   : > { %v562_v10 = vadd.f32 %v561_v5, %v549_v4 }
 0x114   : > { %v579_v9 = vpop.permute.xlu1 %578  ;;  %v574_v11 = vmax.f32 %v573_v6, 0.0 }
 0x115   : > { %v585_v12 = vmul.f32 %v791_v7, %v579_v9 }
 0x116   : > { %v575_v16 = vadd.f32 %v574_v11, %v562_v10 }
 0x117   : > { %v586_v13 = vsub.f32 1.0, %v585_v12 }
 0x119   : > { %v587_v17 = vmax.f32 %v586_v13, 0.0  ;;  %v605_v18 = vpop.permute.xlu1 %604 }
 0x11a   : > { %v611_v19 = vmul.f32 %v793_v15, %v605_v18 }
 0x11b   : > { %v588_v20 = vadd.f32 %v587_v17, %v575_v16 }
 0x11c   : > { %v612_v22 = vsub.f32 1.0, %v611_v19 }
 0x11d   : > { %v601_v25 = vadd.f32 %v600_v21, %v588_v20 }
 0x11e   : > { %v618_v24 = vpop.permute.xlu1 %617  ;;  %v613_v26 = vmax.f32 %v612_v22, 0.0 }
 0x11f   : > { %v624_v27 = vmul.f32 %v794_v23, %v618_v24 }
 0x120   : > { %v614_v29 = vadd.f32 %v613_v26, %v601_v25 }
 0x121   : > { %v625_v28 = vsub.f32 1.0, %v624_v27 }
 0x123   : > { %v626_v30 = vmax.f32 %v625_v28, 0.0 }
 0x125   : > { %v627_v31 = vadd.f32 %v626_v30, %v614_v29 }
 0x127   : > { %632 = vst [vmem:[%s208_s19] sm:$0xff] %v627_v31 }
 0x128   : > { %1006 = shalt.err (!%p1003_p5)
}
 0x129   : > { %s1007_s29 = scalar_lea.hbm %s653_s24, 128  ;;  %s1011_s6 = scalar_lea.hbm %s1338_s2, 256 }
 0x12a   : > { %p1008_p7 = scmp.ne.s32.totalorder %s653_s24, %s1007_s29  ;;  %p1012_p9 = scmp.lt.s32.totalorder %s653_s24, %s1338_s2 }
 0x12b   : > { %p1013_p11 = scmp.lt.s32.totalorder %s1011_s6, %s1007_s29 }
 0x12c   : > { %p1009_p6 = pnand %p1008_p7, %p1218_p13 }
 0x12d   : > { %p1014_p12 = por %p1013_p11, %p1012_p9 }
 0x12e   : > { %p1010_p4 = pneg %p1009_p6 }
 0x130   : > { %p1015_p1 = pnand %p1014_p12, %p1010_p4 }
 0x132   : > { %1018 = shalt.err (!%p1015_p1)
}
 0x133   : > { %805 = dma.vmem_to_hbm [thread:$0]  (%p1218_p13), %s656_s21, 128, %s653_s24, %s641_s26  }
 0x134 PF: > { %s667_s8 = sand.u32 1, %s1057_s9   ;;  %p1350_p8 = scmp.ne.s32.totalorder %s1343_s20, 0 }
 0x135   : > { %p1351_p10 = scmp.ge.s32.totalorder %s1077_s14, 2  ;;  %s668_s16 = scalar_lea.sflag [#allocation4], %s667_s8 }
 0x137   : > { %p816_p0 = pnand %p1351_p10, %p1350_p8 }
 0x139   : > { %p817_p2 = pneg %p816_p0 }
 0x13b   : > { %1052 = dma.done.wait (%p817_p2), %s668_s16, 128  }
 0x13c   : > { %1054 = vsyncadd (%p817_p2), %s668_s16, 4294967168  ;;  %s19_s14 = sadd.s32 1, %s1077_s14   ;;  %s1352_s9 = smov %s1061_s10 }
 0x13d   : > { %p16_p3 = scmp.ge.s32.totalorder %s19_s14, 4   ;;  %s1353_s10 = smov %s1065_s11 }
 0x13e   : > { %s1354_s11 = smov %s1227_s15  ;;  %s1355_s12 = smov %s1073_s13 }
 0x13f   : > { %s1356_s13 = smov %s1358_s25  ;;  %18 = sbr.rel (!%p16_p3) target bundleno = 7 (0x7), region = 86 }
 0x144   :  { %673 = vsyncpa [#allocation3], 1 }
 0x145   :  { %675 = vsyncpa [#allocation3 + $0x1], 1 }
 0x146   :  { %676 = vsyncpa [#allocation6], 1 }
 0x147   :  { %677 = vsyncpa [#allocation4], 1 }
 0x148   :  { %679 = vsyncpa [#allocation4 + $0x1], 1 }

</bundles_post_ra>
